<compile_context>
chip_gen: v7x
topology: tpu7x:2x2x1
jax: 0.10.0
libtpu: 0.0.40
codegen_flags: <defaults>
</compile_context>

<pallas_src>
import functools

import jax
import jax.numpy as jnp
from jax.experimental import pallas as pl
from jax.experimental.pallas import tpu as pltpu


_LANE = 128
_SUBLANE = 8
_MAX_TW = 1024
# Budget for one (input tile + output tile) pair per grid step.  Pipelining
# double-buffers, so resident block memory is ~2x this (~12 MiB).
_TILE_BYTES = 6 * 1024 * 1024
_VMEM_LIMIT = 32 * 1024 * 1024


def _ceil_to(x: int, m: int) -> int:
    return (x + m - 1) // m * m


def _rgb_to_hsv_kernel(x_ref, o_ref, *, training: bool):
    x = x_ref[...]                     # (TB, 3, TH, TW) or (TB, 3, P)
    r = x[:, 0]
    g = x[:, 1]
    b = x[:, 2]

    def store(c, val):
        idx = (slice(None), c) + (slice(None),) * (val.ndim - 1)
        o_ref[idx] = val

    maxc = jnp.maximum(jnp.maximum(r, g), b)
    v = maxc

    if not training:
        # Inference path: only V is needed; hue/saturation never traced.
        store(0, v)
        return

    minc = jnp.minimum(jnp.minimum(r, g), b)
    deltac = maxc - minc
    # s aliases deltac in the torch code; NaNs are zeroed in-place first, so
    # the safe divisor is built from the NaN-fixed value.
    s = jnp.where(jnp.isnan(deltac), jnp.zeros_like(deltac), deltac)
    deltac_safe = jnp.where(s == 0, jnp.ones_like(s), s)

    # One exact reciprocal + three cheap multiplies (instead of 3 divides).
    inv = pl.reciprocal(deltac_safe, approx=False)
    rc = (maxc - r) * inv
    gc = (maxc - g) * inv
    bc = (maxc - b) * inv

    h = 4.0 + gc - rc                                   # default branch
    h = jnp.where(g == maxc, 2.0 + rc - bc, h)          # h[maxg] = ...
    h = jnp.where(r == maxc, bc - gc, h)                # h[maxr] = ... (overrides maxg)
    h = jnp.where(minc == maxc, jnp.zeros_like(h), h)   # h[minc==maxc] = 0
    # (h / 6) mod 1 with a positive constant divisor == t - floor(t).
    t = h * (1.0 / 6.0)
    h = t - jnp.floor(t)

    store(0, h)
    store(1, s)
    store(2, v)


def rgb_to_hsv(image: jax.Array, training: bool = True) -> jax.Array:
    """image: (*, 3, H, W) array in [0, 1]; matches the torch rgb_to_hsv."""
    if image.ndim < 3 or image.shape[-3] != 3:
        raise ValueError(
            "Input size must have a shape of (*, 3, H, W). Got {}".format(image.shape)
        )
    lead = image.shape[:-3]
    H, W = image.shape[-2], image.shape[-1]
    n = 1
    for d in lead:
        n *= d
    x = image.reshape((n, 3, H, W))

    out_c = 3 if training else 1
    itemsize = image.dtype.itemsize
    set_planes = 3 + out_c           # input + output channel planes
    kernel = functools.partial(_rgb_to_hsv_kernel, training=training)

    P = H * W
    # Small, lane-unfriendly images (W < 128): flatten spatial dims so the
    # output's last dim is H*W (lane-dense when H*W >= 128) and batch many
    # images per grid step.  Footprint per image: 8-padded channel slabs for
    # both input and output -> 16 sublane rows of ceil(P/128)*128 lanes.
    flat_img_bytes = 2 * _SUBLANE * _ceil_to(P, _LANE) * itemsize
    use_flat = (W < _LANE) and (8 * flat_img_bytes <= _TILE_BYTES)

    if use_flat:
        tb = max(1, min(n, _TILE_BYTES // flat_img_bytes))
        grid = (pl.cdiv(n, tb),)
        in_specs = [pl.BlockSpec((tb, 3, P), lambda i: (i, 0, 0))]
        out_specs = pl.BlockSpec((tb, out_c, P), lambda i: (i, 0, 0))
        out_shape = jax.ShapeDtypeStruct((n, out_c, P), image.dtype)
        x_in = x.reshape((n, 3, P))
    else:
        # Spatially tiled path: lane-dense W tiles, sublane-aligned H tiles,
        # and (for frames that fit whole) several images per grid step.
        tw = W if W <= _MAX_TW else _MAX_TW
        lanes = _ceil_to(tw, _LANE)
        th_budget = max(_SUBLANE, _TILE_BYTES // (set_planes * itemsize * lanes))
        th = H if H <= th_budget else max(_SUBLANE, th_budget // _SUBLANE * _SUBLANE)
        if th == H and tw == W:
            img_bytes = (set_planes * _ceil_to(H, _SUBLANE)
                         * _ceil_to(W, _LANE) * itemsize)
            tb = max(1, min(n, _TILE_BYTES // max(1, img_bytes)))
        else:
            tb = 1
        grid = (pl.cdiv(n, tb), pl.cdiv(H, th), pl.cdiv(W, tw))
        in_specs = [pl.BlockSpec((tb, 3, th, tw), lambda i, j, k: (i, 0, j, k))]
        out_specs = pl.BlockSpec((tb, out_c, th, tw), lambda i, j, k: (i, 0, j, k))
        out_shape = jax.ShapeDtypeStruct((n, out_c, H, W), image.dtype)
        x_in = x

    out = pl.pallas_call(
        kernel,
        out_shape=out_shape,
        grid=grid,
        in_specs=in_specs,
        out_specs=out_specs,
        compiler_params=pltpu.CompilerParams(
            dimension_semantics=("parallel",) * len(grid),
            vmem_limit_bytes=_VMEM_LIMIT,
        ),
    )(x_in)

    out = out.reshape((n, out_c, H, W))
    if training:
        return out.reshape(lead + (3, H, W))
    # torch does `torch.unsqueeze(v, 1)` on the channel-squeezed v.
    return jnp.expand_dims(out.reshape(lead + (H, W)), 1)


def _rgb_to_hsv_ref(image: jnp.ndarray, training: bool) -> jnp.ndarray:
    # Pure-JAX transcription of the torch reference (divides + jnp.mod).
    r = image[..., 0, :, :]
    g = image[..., 1, :, :]
    b = image[..., 2, :, :]
    maxc = jnp.max(image, axis=-3)
    minc = jnp.min(image, axis=-3)
    v = maxc
    deltac = maxc - minc
    s = jnp.where(jnp.isnan(deltac), 0.0, deltac)
    dsafe = jnp.where(s == 0, 1.0, s)
    rc = (maxc - r) / dsafe
    gc = (maxc - g) / dsafe
    bc = (maxc - b) / dsafe
    h = 4.0 + gc - rc
    h = jnp.where(g == maxc, 2.0 + rc - bc, h)
    h = jnp.where(r == maxc, bc - gc, h)
    h = jnp.where(minc == maxc, 0.0, h)
    h = jnp.mod(h / 6.0, 1.0)
    if training:
        return jnp.stack([h, s, v], axis=-3)
    return jnp.expand_dims(v, 1)


def _check(out, ref, training):
    if training:
        # Hue is periodic with period 1: compare circularly so ulp-level
        # differences that wrap around 0/1 do not blow up the comparison.
        dh = jnp.abs(out[..., 0, :, :] - ref[..., 0, :, :])
        dh = jnp.minimum(dh, 1.0 - dh)
        assert bool(jnp.all(dh < 1e-5))
        assert jnp.allclose(out[..., 1:, :, :], ref[..., 1:, :, :],
                            atol=1e-6, rtol=1e-6)
    else:
        assert jnp.allclose(out, ref, atol=1e-6, rtol=1e-6)


if __name__ == "__main__":
    key = jax.random.PRNGKey(0)
    k1, k2, k3 = jax.random.split(key, 3)

    # Small images (W < 128): flattened, lane-dense, batched path.
    x_small = jax.random.uniform(k1, (2, 3, 16, 16), dtype=jnp.float32)
    hsv = jax.block_until_ready(rgb_to_hsv(x_small, training=True))
    assert hsv.shape == (2, 3, 16, 16)
    _check(hsv, _rgb_to_hsv_ref(x_small, True), True)

    v_only = jax.block_until_ready(rgb_to_hsv(x_small, training=False))
    assert v_only.shape == (2, 1, 16, 16)
    _check(v_only, _rgb_to_hsv_ref(x_small, False), False)

    # Lane-aligned small images: 4D batched (TB, 3, H, W) path.
    x_wide = jax.random.uniform(k2, (2, 3, 8, 128), dtype=jnp.float32)
    hsv_w = jax.block_until_ready(rgb_to_hsv(x_wide, training=True))
    assert hsv_w.shape == (2, 3, 8, 128)
    _check(hsv_w, _rgb_to_hsv_ref(x_wide, True), True)

    # Larger frame: spatially tiled path (grid over H tiles).
    x_big = jax.random.uniform(k3, (1, 3, 512, 1024), dtype=jnp.float32)
    hsv_b = jax.block_until_ready(rgb_to_hsv(x_big, training=True))
    assert hsv_b.shape == (1, 3, 512, 1024)
    _check(hsv_b, _rgb_to_hsv_ref(x_big, True), True)

    print("KERNEL_OK")
</pallas_src>

<mosaic_0001>
module attributes {stable_mosaic.version = 11 : i64} {
  func.func @_rgb_to_hsv_kernel(%arg0: i32, %arg1: memref<2x3x256xf32, #tpu.memory_space<vmem>>, %arg2: memref<2x3x256xf32, #tpu.memory_space<vmem>>) attributes {dimension_semantics = [#tpu.dimension_semantics<parallel>], iteration_bounds = array<i64: 1>, scalar_prefetch = 0 : i64, scratch_operands = 0 : i64, tpu.core_type = #tpu.core_type<tc>, window_params = [{transform_indices = @transform_0, window_bounds = array<i64: 2, 3, 256>}, {transform_indices = @transform_1, window_bounds = array<i64: 2, 3, 256>}]} {
    %c0 = arith.constant 0 : index
    %c0_0 = arith.constant 0 : index
    %c0_1 = arith.constant 0 : index
    %0 = vector.load %arg1[%c0, %c0_0, %c0_1] : memref<2x3x256xf32, #tpu.memory_space<vmem>>, vector<2x3x256xf32>
    %1 = vector.extract_strided_slice %0 {offsets = [0, 0, 0], sizes = [2, 1, 256], strides = [1, 1, 1]} : vector<2x3x256xf32> to vector<2x1x256xf32>
    %2 = vector.shape_cast %1 : vector<2x1x256xf32> to vector<2x256xf32>
    %3 = vector.extract_strided_slice %0 {offsets = [0, 1, 0], sizes = [2, 1, 256], strides = [1, 1, 1]} : vector<2x3x256xf32> to vector<2x1x256xf32>
    %4 = vector.shape_cast %3 : vector<2x1x256xf32> to vector<2x256xf32>
    %5 = vector.extract_strided_slice %0 {offsets = [0, 2, 0], sizes = [2, 1, 256], strides = [1, 1, 1]} : vector<2x3x256xf32> to vector<2x1x256xf32>
    %6 = vector.shape_cast %5 : vector<2x1x256xf32> to vector<2x256xf32>
    %7 = arith.maximumf %2, %4 : vector<2x256xf32>
    %8 = arith.maximumf %7, %6 : vector<2x256xf32>
    %9 = arith.minimumf %2, %4 : vector<2x256xf32>
    %10 = arith.minimumf %9, %6 : vector<2x256xf32>
    %11 = arith.subf %8, %10 : vector<2x256xf32>
    %12 = arith.cmpf one, %11, %11 : vector<2x256xf32>
    %cst = arith.constant 0.000000e+00 : f32
    %13 = vector.broadcast %cst : f32 to vector<2x256xf32>
    %14 = arith.select %12, %13, %11 : vector<2x256xi1>, vector<2x256xf32>
    %cst_2 = arith.constant 0.000000e+00 : f32
    %15 = vector.broadcast %cst_2 : f32 to vector<2x256xf32>
    %16 = arith.cmpf oeq, %14, %15 : vector<2x256xf32>
    %cst_3 = arith.constant 1.000000e+00 : f32
    %17 = vector.broadcast %cst_3 : f32 to vector<2x256xf32>
    %18 = arith.select %16, %17, %14 : vector<2x256xi1>, vector<2x256xf32>
    %19 = tpu.reciprocal %18 : vector<2x256xf32> -> vector<2x256xf32>
    %20 = arith.subf %8, %2 : vector<2x256xf32>
    %21 = arith.mulf %20, %19 : vector<2x256xf32>
    %22 = arith.subf %8, %4 : vector<2x256xf32>
    %23 = arith.mulf %22, %19 : vector<2x256xf32>
    %24 = arith.subf %8, %6 : vector<2x256xf32>
    %25 = arith.mulf %24, %19 : vector<2x256xf32>
    %cst_4 = arith.constant 4.000000e+00 : f32
    %26 = vector.broadcast %cst_4 : f32 to vector<2x256xf32>
    %27 = arith.addf %26, %23 : vector<2x256xf32>
    %28 = arith.subf %27, %21 : vector<2x256xf32>
    %29 = arith.cmpf oeq, %4, %8 : vector<2x256xf32>
    %cst_5 = arith.constant 2.000000e+00 : f32
    %30 = vector.broadcast %cst_5 : f32 to vector<2x256xf32>
    %31 = arith.addf %30, %21 : vector<2x256xf32>
    %32 = arith.subf %31, %25 : vector<2x256xf32>
    %33 = arith.select %29, %32, %28 : vector<2x256xi1>, vector<2x256xf32>
    %34 = arith.cmpf oeq, %2, %8 : vector<2x256xf32>
    %35 = arith.subf %25, %23 : vector<2x256xf32>
    %36 = arith.select %34, %35, %33 : vector<2x256xi1>, vector<2x256xf32>
    %37 = arith.cmpf oeq, %10, %8 : vector<2x256xf32>
    %cst_6 = arith.constant 0.000000e+00 : f32
    %38 = vector.broadcast %cst_6 : f32 to vector<2x256xf32>
    %39 = arith.select %37, %38, %36 : vector<2x256xi1>, vector<2x256xf32>
    %cst_7 = arith.constant 0.166666672 : f32
    %40 = vector.broadcast %cst_7 : f32 to vector<2x256xf32>
    %41 = arith.mulf %39, %40 : vector<2x256xf32>
    %42 = math.floor %41 : vector<2x256xf32>
    %43 = arith.subf %41, %42 : vector<2x256xf32>
    %c0_8 = arith.constant 0 : index
    %c0_9 = arith.constant 0 : index
    %c0_10 = arith.constant 0 : index
    %44 = vector.load %arg2[%c0_8, %c0_9, %c0_10] : memref<2x3x256xf32, #tpu.memory_space<vmem>>, vector<2x1x256xf32>
    %45 = vector.shape_cast %44 : vector<2x1x256xf32> to vector<2x256xf32>
    %46 = vector.shape_cast %43 : vector<2x256xf32> to vector<2x1x256xf32>
    tpu.vector_store %arg2[%c0_8, %c0_9, %c0_10], %46 {strides = array<i32>} : memref<2x3x256xf32, #tpu.memory_space<vmem>>, vector<2x1x256xf32>,
    %c0_11 = arith.constant 0 : index
    %c1 = arith.constant 1 : index
    %c0_12 = arith.constant 0 : index
    %47 = vector.load %arg2[%c0_11, %c1, %c0_12] : memref<2x3x256xf32, #tpu.memory_space<vmem>>, vector<2x1x256xf32>
    %48 = vector.shape_cast %47 : vector<2x1x256xf32> to vector<2x256xf32>
    %49 = vector.shape_cast %14 : vector<2x256xf32> to vector<2x1x256xf32>
    tpu.vector_store %arg2[%c0_11, %c1, %c0_12], %49 {strides = array<i32>} : memref<2x3x256xf32, #tpu.memory_space<vmem>>, vector<2x1x256xf32>,
    %c0_13 = arith.constant 0 : index
    %c2 = arith.constant 2 : index
    %c0_14 = arith.constant 0 : index
    %50 = vector.load %arg2[%c0_13, %c2, %c0_14] : memref<2x3x256xf32, #tpu.memory_space<vmem>>, vector<2x1x256xf32>
    %51 = vector.shape_cast %50 : vector<2x1x256xf32> to vector<2x256xf32>
    %52 = vector.shape_cast %8 : vector<2x256xf32> to vector<2x1x256xf32>
    tpu.vector_store %arg2[%c0_13, %c2, %c0_14], %52 {strides = array<i32>} : memref<2x3x256xf32, #tpu.memory_space<vmem>>, vector<2x1x256xf32>,
    return
  }
  func.func @transform_0(%arg0: i32) -> (i32, i32, i32) {
    %c0_i32 = arith.constant 0 : i32
    %c0_i32_0 = arith.constant 0 : i32
    %c0_i32_1 = arith.constant 0 : i32
    return %arg0, %c0_i32, %c0_i32_0 : i32, i32, i32
  }
  func.func @transform_1(%arg0: i32) -> (i32, i32, i32) {
    %c0_i32 = arith.constant 0 : i32
    %c0_i32_0 = arith.constant 0 : i32
    %c0_i32_1 = arith.constant 0 : i32
    return %arg0, %c0_i32, %c0_i32_0 : i32, i32, i32
  }
}

</mosaic_0001>

<bundles_post_ra>
// kernel: tpu_custom_call.1
= control target key start
LH: loop header
LB: loop body
LE: loop exit
PB: predicated region body
PF: predicated region fallthrough
CT: control target
= control target key end

     0   :  { %v235_v4 = vmov 1966171168   ;;  %v115_v6 = vlaneseq  ;;  %s346_s0 = inlined_call_operand.vmem [shape: f32[2,3,256], index: 0, kind: input, shape index: {}]   ;;  %s347_s1 = inlined_call_operand.vmem [shape: f32[2,3,256], index: 1, kind: output, shape index: {}]  }
   0x1   :  { %v249_v0 = vld [vmem:[%s346_s0] sm:$0x77]  ;;  %v254_v1 = vld [vmem:[%s346_s0 + $0x8] sm:$0x77]  ;;  %v113_v5 = vunpack.c.l.s4 %v235_v4 }
   0x2   :  { %v12_v2 = vrot.slane %v249_v0, 5  ;;  %v20_v3 = vrot.slane %v249_v0, 6  ;;  %v14_v7 = vrot.slane %v254_v1, 5  ;;  %v22_v8 = vrot.slane %v254_v1, 6 }
   0x3   :  { %v114_v15 = vunpack.c.0.s8 %v113_v5  ;;  %v116_v16 = vshrl.u32 %v115_v6, 7  ;;  %vm278_vm3 = vcmp.lt.s32.totalorder %v115_v6, 256 }
   0x4   :  { %v13_v9 = vrot.slane %v12_v2, 4  ;;  %v21_v10 = vrot.slane %v20_v3, 4  ;;  %v15_v11 = vrot.slane %v14_v7, 4  ;;  %v23_v12 = vrot.slane %v22_v8, 4 }
   0x5   :  { %v274_v24 = vsub.s32 %v114_v15, %v116_v16 }
   0x6   :  { %v18_v13 = vmax.f32 %v249_v0, %v13_v9  ;;  %v28_v14 = vmin.f32 %v249_v0, %v13_v9  ;;  %v19_v17 = vmax.f32 %v254_v1, %v15_v11  ;;  %v29_v18 = vmin.f32 %v254_v1, %v15_v11 }
   0x8   :  { %v264_v19 = vmax.f32 %v18_v13, %v21_v10  ;;  %v266_v20 = vmin.f32 %v28_v14, %v21_v10  ;;  %v268_v21 = vmax.f32 %v19_v17, %v23_v12  ;;  %v270_v22 = vmin.f32 %v29_v18, %v23_v12 }
   0xa   :  { %v32_v23 = vsub.f32 %v264_v19, %v266_v20  ;;  %v33_v25 = vsub.f32 %v268_v21, %v270_v22  ;;  %v191_v33 = vrot.slane %v264_v19, %v274_v24  ;;  %v205_v35 = vrot.slane %v268_v21, %v274_v24 }
   0xb   :  { %v44_v39 = vsub.f32 %v264_v19, %v249_v0  ;;  %v48_v40 = vsub.f32 %v264_v19, %v13_v9  ;;  %v52_v41 = vsub.f32 %v264_v19, %v21_v10  ;;  %v45_v42 = vsub.f32 %v268_v21, %v254_v1 }
   0xc   :  { %vm34_vm0 = vcmp.ne.f32.partialorder %v32_v23, %v32_v23  ;;  %vm35_vm1 = vcmp.ne.f32.partialorder %v33_v25, %v33_v25  ;;  %v198_v37 = vrot.slane %v191_v33, %v274_v24  ;;  %v212_v38 = vrot.slane %v205_v35, %v274_v24 }
   0xd   :  { %v36_v26 = vsel %vm34_vm0, 0.0, %v32_v23  ;;  %v37_v27 = vsel %vm35_vm1, 0.0, %v33_v25  ;;  %v49_v43 = vsub.f32 %v268_v21, %v15_v11  ;;  %v53_v44 = vsub.f32 %v268_v21, %v23_v12 }
   0xe   :  { %vm38_vm2 = vcmp.eq.f32.partialorder %v36_v26, 0.0  ;;  %vm39_vm4 = vcmp.eq.f32.partialorder %v37_v27, 0.0  ;;  %v157_v30 = vrot.slane %v36_v26, %v274_v24  ;;  %v171_v32 = vrot.slane %v37_v27, %v274_v24  ;;  %228 = vst.msk [vmem:[%s347_s1 + $0x2] ss:$4 sm:$0x3] %vm278_vm3, %v198_v37 }
   0xf   :  { %v40_v28 = vsel %vm38_vm2, 1.0, %v36_v26  ;;  %v41_v31 = vsel %vm39_vm4, 1.0, %v37_v27  ;;  %229 = vst.msk [vmem:[%s347_s1 + $0xa] ss:$4 sm:$0x3] %vm278_vm3, %v212_v38  ;;  %v62_v50 = vrot.slane %v264_v19, 7  ;;  %vm86_vm7 = vcmp.eq.f32.partialorder %v249_v0, %v264_v19 }
  0x10   :  { %231 = vrcp.f32 %v40_v28  ;;  %v164_v34 = vrot.slane %v157_v30, %v274_v24  ;;  %v178_v36 = vrot.slane %v171_v32, %v274_v24  ;;  %v63_v56 = vrot.slane %v268_v21, 7 }
  0x11   :  { %233 = vrcp.f32 %v41_v31  ;;  %vm66_vm5 = vcmp.eq.f32.partialorder %v249_v0, %v62_v50  ;;  %vm100_vm8 = vcmp.eq.f32.partialorder %v266_v20, %v264_v19  ;;  %vm87_vm9 = vcmp.eq.f32.partialorder %v254_v1, %v268_v21 }
  0x12   :  { %226 = vst.msk [vmem:[%s347_s1 + $0x1] ss:$4 sm:$0x3] %vm278_vm3, %v164_v34  ;;  %227 = vst.msk [vmem:[%s347_s1 + $0x9] ss:$4 sm:$0x3] %vm278_vm3, %v178_v36  ;;  %vm67_vm6 = vcmp.eq.f32.partialorder %v254_v1, %v63_v56  ;;  %vm101_vm10 = vcmp.eq.f32.partialorder %v270_v22, %v268_v21 }
  0x1a   :  { %v232_v45 = vpop.eup %231 }
  0x1b   :  { %v234_v46 = vpop.eup %233  ;;  %v46_v47 = vmul.f32 %v232_v45, %v44_v39  ;;  %v50_v48 = vmul.f32 %v232_v45, %v48_v40  ;;  %v54_v49 = vmul.f32 %v232_v45, %v52_v41 }
  0x1c   :  { %v47_v51 = vmul.f32 %v234_v46, %v45_v42  ;;  %v51_v52 = vmul.f32 %v234_v46, %v49_v43  ;;  %v55_v53 = vmul.f32 %v234_v46, %v53_v44 }
  0x1d   :  { %v56_v54 = vadd.f32 4.0, %v50_v48  ;;  %v68_v55 = vadd.f32 2.0, %v46_v47  ;;  %v88_v3 = vsub.f32 %v54_v49, %v50_v48 }
  0x1e   :  { %v57_v57 = vadd.f32 4.0, %v51_v52  ;;  %v69_v58 = vadd.f32 2.0, %v47_v51  ;;  %v89_v7 = vsub.f32 %v55_v53, %v51_v52 }
  0x1f   :  { %v58_v59 = vsub.f32 %v56_v54, %v46_v47  ;;  %v70_v60 = vsub.f32 %v68_v55, %v54_v49 }
  0x20   :  { %v59_v61 = vsub.f32 %v57_v57, %v47_v51  ;;  %v71_v62 = vsub.f32 %v69_v58, %v55_v53 }
  0x21   :  { %v74_v63 = vrot.slane %v70_v60, 7  ;;  %v80_v2 = vrot.slane %v58_v59, 7 }
  0x22   :  { %v75_v4 = vrot.slane %v71_v62, 7  ;;  %v81_v5 = vrot.slane %v59_v61, 7 }
  0x23   :  { %v84_v6 = vsel %vm66_vm5, %v74_v63, %v80_v2 }
  0x24   :  { %v223_v8 = vrot.slane %v84_v6, 9  ;;  %v85_v9 = vsel %vm67_vm6, %v75_v4, %v81_v5 }
  0x25   :  { %v224_v10 = vrot.slane %v85_v9, 9 }
  0x26   :  { %v98_v11 = vsel %vm86_vm7, %v88_v3, %v223_v8 }
  0x27   :  { %v102_v12 = vsel %vm100_vm8, 0.0, %v98_v11  ;;  %v99_v13 = vsel %vm87_vm9, %v89_v7, %v224_v10 }
  0x28   :  { %v104_v14 = vmul.f32 0.16666667, %v102_v12  ;;  %v103_v15 = vsel %vm101_vm10, 0.0, %v99_v13 }
  0x29   :  { %v105_v16 = vmul.f32 0.16666667, %v103_v15 }
  0x2a   :  { %v106_v0 = vfloor.f32 %v104_v14 }
  0x2b   :  { %v107_v17 = vfloor.f32 %v105_v16 }
  0x2c   :  { %v108_v18 = vsub.f32 %v104_v14, %v106_v0 }
  0x2d   :  { %v109_v23 = vsub.f32 %v105_v16, %v107_v17 }
  0x2e   :  { %v118_v19 = vrot.slane %v108_v18, %v274_v24 }
  0x2f   :  { %v132_v20 = vrot.slane %v109_v23, %v274_v24 }
  0x30   :  { %v125_v1 = vrot.slane %v118_v19, %v274_v24 }
  0x31   :  { %v139_v25 = vrot.slane %v132_v20, %v274_v24 }
  0x32   :  { %146 = vst.msk [vmem:[%s347_s1] ss:$4 sm:$0x3] %vm278_vm3, %v125_v1 }
  0x33   :  { %225 = vst.msk [vmem:[%s347_s1 + $0x8] ss:$4 sm:$0x3] %vm278_vm3, %v139_v25 }

</bundles_post_ra>
